<compile_context>
chip_gen: v5e
topology: v5e:2x2
jax: 0.10.0
libtpu: 0.0.40
codegen_flags: <defaults>
</compile_context>

<pallas_src>
import math

import jax
import jax.numpy as jnp
from jax.experimental import pallas as pl
from jax.experimental.pallas import tpu as pltpu


def _round_up(a: int, b: int) -> int:
    return (a + b - 1) // b * b


# ------------------------- Stage 1: XW = x @ W + b ---------------------------
def _xw_bias_kernel(x_ref, w_ref, b_ref, o_ref, acc_ref):
    # x_ref: (tn, tki) input dtype, w_ref: (tki, f_pad) bf16, b_ref: (1, f_pad) f32
    k = pl.program_id(1)

    @pl.when(k == 0)
    def _():
        acc_ref[...] = jnp.zeros_like(acc_ref)

    acc_ref[...] += jnp.dot(x_ref[...].astype(jnp.bfloat16), w_ref[...],
                            preferred_element_type=jnp.float32)

    @pl.when(k == pl.num_programs(1) - 1)
    def _():
        o_ref[...] = (acc_ref[...] + b_ref[...]).astype(o_ref.dtype)


# ------------------------- Stage 2: out = G @ XW -----------------------------
def _make_g_kernel(*, n_valid, tk, xw_resident, mask_k, use_scratch):
    """out[i,:] = sum_k G[i, k-slab] @ XW[k-slab, :]  (f32 accumulation)."""

    def kernel(g_ref, xw_ref, o_ref, *scratch):
        acc_ref = scratch[0] if use_scratch else o_ref
        k = pl.program_id(1)

        @pl.when(k == 0)
        def _():
            acc_ref[...] = jnp.zeros_like(acc_ref)

        g = g_ref[...]
        if mask_k:
            # Last K tile overhangs the real node count: zero the garbage cols.
            col = k * tk + jax.lax.broadcasted_iota(jnp.int32, g.shape, 1)
            g = jnp.where(col < n_valid, g, 0)
        g = g.astype(jnp.bfloat16)          # cast hides under MXU

        if xw_resident:
            start = pl.multiple_of(k * tk, tk)
            xw = xw_ref[pl.ds(start, tk), :]
        else:
            xw = xw_ref[...]

        acc_ref[...] += jnp.dot(g, xw, preferred_element_type=jnp.float32)

        if use_scratch:
            @pl.when(k == pl.num_programs(1) - 1)
            def _():
                o_ref[...] = acc_ref[...].astype(o_ref.dtype)

    return kernel


def hgnn_conv(x, G, weight, bias=None):
    """out = G @ (x @ weight + bias) via two Pallas TPU kernels."""
    N, in_ft = x.shape
    out_ft = weight.shape[1]
    out_dtype = x.dtype

    f_pad = _round_up(out_ft, 128)          # lane-dense output columns

    # ---- tile selection: big, lane-dense, nested (tk % tn == 0) ----
    tn = min(512, _round_up(N, 128))
    if f_pad >= 2048:
        tn = min(tn, 256)                   # keep out/acc blocks within VMEM budget
    if 128 < N <= 512:
        # Give v7x's second TensorCore at least 2 row tiles on small graphs.
        tn = min(tn, _round_up((N + 1) // 2, 128))
    tk_cap = 1024 if f_pad <= 1024 else 512
    tk = min(tk_cap, _round_up(N, 128))
    tk = max(tn, (tk // tn) * tn)           # nesting guard: tk multiple of tn

    n_pad = _round_up(N, tk)                # XW row count (stage-2 K blocks exact)
    grid_i = pl.cdiv(N, tn)
    grid_k = n_pad // tk                    # == cdiv(N, tk)

    # ---- stage 1: XW = x @ W + b (K-tiled over in_ft when large) ----
    if in_ft <= 1024:
        tki, k_pad = in_ft, in_ft
    else:
        tki = 512
        k_pad = _round_up(in_ft, tki)

    x_p = x
    if n_pad != N or k_pad != in_ft:
        # x / W / bias are O(N*in_ft) — cheap to pad (only G's N^2 copy is avoided).
        x_p = jnp.pad(x, ((0, n_pad - N), (0, k_pad - in_ft)))
    w_p = weight.astype(jnp.bfloat16)
    if k_pad != in_ft or f_pad != out_ft:
        w_p = jnp.pad(w_p, ((0, k_pad - in_ft), (0, f_pad - out_ft)))
    if bias is None:
        b_p = jnp.zeros((1, f_pad), jnp.float32)
    else:
        b_p = jnp.pad(bias.astype(jnp.float32),
                      (0, f_pad - out_ft)).reshape(1, f_pad)

    x_isz = x.dtype.itemsize
    vmem1 = (2 * tn * tki * x_isz           # x block (double-buffered)
             + 2 * tki * f_pad * 2          # W block
             + 2 * tn * f_pad * 2           # XW out block
             + tn * f_pad * 4               # f32 accumulator
             + 2 * f_pad * 4)               # bias
    vmem1 = int(min(64 << 20, max(32 << 20, vmem1 + (4 << 20))))

    xw = pl.pallas_call(
        _xw_bias_kernel,
        out_shape=jax.ShapeDtypeStruct((n_pad, f_pad), jnp.bfloat16),
        grid_spec=pltpu.PrefetchScalarGridSpec(
            num_scalar_prefetch=0,
            grid=(n_pad // tn, k_pad // tki),
            in_specs=[
                pl.BlockSpec((tn, tki), lambda i, k: (i, k)),      # x tile
                pl.BlockSpec((tki, f_pad), lambda i, k: (k, 0)),   # W K-slab
                pl.BlockSpec((1, f_pad), lambda i, k: (0, 0)),     # bias (invariant)
            ],
            out_specs=pl.BlockSpec((tn, f_pad), lambda i, k: (i, 0)),
            scratch_shapes=[pltpu.VMEM((tn, f_pad), jnp.float32)],
        ),
        compiler_params=pltpu.CompilerParams(
            dimension_semantics=("parallel", "arbitrary"),
            vmem_limit_bytes=vmem1),
    )(x_p, w_p, b_p)
    # Padded x rows give XW rows == bias (finite); their G columns are masked
    # to zero in stage 2, so they contribute nothing to real output rows.

    # ---- stage 2: out = G @ XW ----
    g_isz = G.dtype.itemsize
    out_isz = x.dtype.itemsize
    xw_bytes = n_pad * f_pad * 2
    xw_resident = (2 * xw_bytes) <= (8 << 20)   # keep whole XW in VMEM if cheap
    mask_k = (N % tk) != 0
    use_scratch = (out_dtype != jnp.float32)    # f32 outputs accumulate in-place

    vmem2 = (2 * tn * tk * g_isz
             + (2 * xw_bytes if xw_resident else 2 * tk * f_pad * 2)
             + 2 * tn * f_pad * out_isz
             + (tn * f_pad * 4 if use_scratch else 0))
    vmem2 = int(min(64 << 20, max(32 << 20, vmem2 + (4 << 20))))

    if xw_resident:
        xw_spec = pl.BlockSpec((n_pad, f_pad), lambda i, k: (0, 0))   # DMA'd once
    else:
        xw_spec = pl.BlockSpec((tk, f_pad), lambda i, k: (k, 0))      # streamed K-slab

    kernel = _make_g_kernel(n_valid=N, tk=tk, xw_resident=xw_resident,
                            mask_k=mask_k, use_scratch=use_scratch)

    out_p = pl.pallas_call(
        kernel,
        out_shape=jax.ShapeDtypeStruct((N, f_pad), out_dtype),
        grid_spec=pltpu.PrefetchScalarGridSpec(
            num_scalar_prefetch=0,
            grid=(grid_i, grid_k),
            in_specs=[
                pl.BlockSpec((tn, tk), lambda i, k: (i, k)),  # G tile, raw dtype,
                xw_spec,                                      # cast/masked in-kernel
            ],
            out_specs=pl.BlockSpec((tn, f_pad), lambda i, k: (i, 0)),
            scratch_shapes=([pltpu.VMEM((tn, f_pad), jnp.float32)]
                            if use_scratch else []),
        ),
        compiler_params=pltpu.CompilerParams(
            dimension_semantics=("parallel", "arbitrary"),
            vmem_limit_bytes=vmem2),
    )(G, xw)

    if f_pad != out_ft:
        out_p = out_p[:, :out_ft]
    return out_p


if __name__ == "__main__":
    # Small shapes consistent with the module's forward.
    N, in_ft, out_ft = 32, 16, 32

    key = jax.random.PRNGKey(0)
    kx, kg, kw, kb = jax.random.split(key, 4)

    x = jax.random.normal(kx, (N, in_ft), dtype=jnp.float32)
    G = jax.random.normal(kg, (N, N), dtype=jnp.float32)

    # Parameter init mirroring reset_parameters(): uniform(-stdv, stdv), stdv=1/sqrt(out_ft)
    stdv = 1.0 / math.sqrt(out_ft)
    weight = jax.random.uniform(kw, (in_ft, out_ft), dtype=jnp.float32,
                                minval=-stdv, maxval=stdv)
    bias = jax.random.uniform(kb, (out_ft,), dtype=jnp.float32,
                              minval=-stdv, maxval=stdv)

    out = hgnn_conv(x, G, weight, bias)
    out = jax.block_until_ready(out)
    assert out.shape == (N, out_ft)

    # Reference matching the kernel's bf16-in / f32-accumulate numerics.
    xb = x.astype(jnp.bfloat16).astype(jnp.float32)
    wb = weight.astype(jnp.bfloat16).astype(jnp.float32)
    gb = G.astype(jnp.bfloat16).astype(jnp.float32)
    xw_ref = (xb @ wb + bias).astype(jnp.bfloat16).astype(jnp.float32)
    ref = gb @ xw_ref
    assert jnp.allclose(out, ref, atol=2e-2, rtol=2e-2), "mismatch vs reference"

    # Sanity vs the pure-fp32 PyTorch-equivalent forward (looser, bf16 rounding).
    ref_f32 = G @ (x @ weight + bias)
    assert jnp.allclose(out, ref_f32, atol=1e-1, rtol=1e-1), "mismatch vs f32 reference"

    print("KERNEL_OK")
</pallas_src>

<mosaic_0001>
module attributes {stable_mosaic.version = 11 : i64} {
  func.func @_xw_bias_kernel(%arg0: i32, %arg1: i32, %arg2: memref<128x16xf32, #tpu.memory_space<vmem>>, %arg3: memref<16x128xbf16, #tpu.memory_space<vmem>>, %arg4: memref<1x128xf32, #tpu.memory_space<vmem>>, %arg5: memref<128x128xbf16, #tpu.memory_space<vmem>>, %arg6: memref<128x128xf32, #tpu.memory_space<vmem>>) attributes {dimension_semantics = [#tpu.dimension_semantics<parallel>, #tpu.dimension_semantics<arbitrary>], iteration_bounds = array<i64: 1, 1>, scalar_prefetch = 0 : i64, scratch_operands = 1 : i64, tpu.core_type = #tpu.core_type<tc>, window_params = [{transform_indices = @transform_0, window_bounds = array<i64: 128, 16>}, {transform_indices = @transform_1, window_bounds = array<i64: 16, 128>}, {pipeline_mode = #tpu.pipeline_mode<synchronous>, transform_indices = @transform_2, window_bounds = array<i64: 1, 128>}, {transform_indices = @transform_3, window_bounds = array<i64: 128, 128>}]} {
    %c0_i32 = arith.constant 0 : i32
    %0 = arith.cmpi eq, %arg1, %c0_i32 : i32
    %1 = arith.extui %0 : i1 to i32
    %c0_i32_0 = arith.constant 0 : i32
    %2 = arith.cmpi ne, %1, %c0_i32_0 : i32
    scf.if %2 {
      %cst_10 = arith.constant 0.000000e+00 : f32
      %13 = vector.broadcast %cst_10 : f32 to vector<128x128xf32>
      %c0_11 = arith.constant 0 : index
      %c0_12 = arith.constant 0 : index
      %14 = vector.load %arg6[%c0_11, %c0_12] : memref<128x128xf32, #tpu.memory_space<vmem>>, vector<128x128xf32>
      tpu.vector_store %arg6[%c0_11, %c0_12], %13 {strides = array<i32>} : memref<128x128xf32, #tpu.memory_space<vmem>>, vector<128x128xf32>,
    } else {
    }
    %c0 = arith.constant 0 : index
    %c0_1 = arith.constant 0 : index
    %3 = vector.load %arg6[%c0, %c0_1] : memref<128x128xf32, #tpu.memory_space<vmem>>, vector<128x128xf32>
    %c0_2 = arith.constant 0 : index
    %c0_3 = arith.constant 0 : index
    %4 = vector.load %arg2[%c0_2, %c0_3] : memref<128x16xf32, #tpu.memory_space<vmem>>, vector<128x16xf32>
    %5 = arith.truncf %4 : vector<128x16xf32> to vector<128x16xbf16>
    %c0_4 = arith.constant 0 : index
    %c0_5 = arith.constant 0 : index
    %6 = vector.load %arg3[%c0_4, %c0_5] : memref<16x128xbf16, #tpu.memory_space<vmem>>, vector<16x128xbf16>
    %cst = arith.constant dense<0.000000e+00> : vector<128x128xf32>
    %7 = tpu.matmul %5, %6, %cst {dimension_numbers = #tpu.dot_dimension_numbers<[1], [0], [0], [1], [0, 0, 1, 1], [], []>} : vector<128x16xbf16>, vector<16x128xbf16>, vector<128x128xf32> -> vector<128x128xf32>
    %8 = arith.addf %3, %7 : vector<128x128xf32>
    %c0_6 = arith.constant 0 : index
    %c0_7 = arith.constant 0 : index
    %9 = vector.load %arg6[%c0_6, %c0_7] : memref<128x128xf32, #tpu.memory_space<vmem>>, vector<128x128xf32>
    tpu.vector_store %arg6[%c0_6, %c0_7], %8 {strides = array<i32>} : memref<128x128xf32, #tpu.memory_space<vmem>>, vector<128x128xf32>,
    %c0_i32_8 = arith.constant 0 : i32
    %10 = arith.cmpi eq, %arg1, %c0_i32_8 : i32
    %11 = arith.extui %10 : i1 to i32
    %c0_i32_9 = arith.constant 0 : i32
    %12 = arith.cmpi ne, %11, %c0_i32_9 : i32
    scf.if %12 {
      %c0_10 = arith.constant 0 : index
      %c0_11 = arith.constant 0 : index
      %13 = vector.load %arg6[%c0_10, %c0_11] : memref<128x128xf32, #tpu.memory_space<vmem>>, vector<128x128xf32>
      %c0_12 = arith.constant 0 : index
      %c0_13 = arith.constant 0 : index
      %14 = vector.load %arg4[%c0_12, %c0_13] : memref<1x128xf32, #tpu.memory_space<vmem>>, vector<1x128xf32>
      %15 = vector.broadcast %14 : vector<1x128xf32> to vector<128x128xf32>
      %16 = arith.addf %13, %15 : vector<128x128xf32>
      %17 = arith.truncf %16 : vector<128x128xf32> to vector<128x128xbf16>
      %c0_14 = arith.constant 0 : index
      %c0_15 = arith.constant 0 : index
      %18 = vector.load %arg5[%c0_14, %c0_15] : memref<128x128xbf16, #tpu.memory_space<vmem>>, vector<128x128xbf16>
      tpu.vector_store %arg5[%c0_14, %c0_15], %17 {strides = array<i32>} : memref<128x128xbf16, #tpu.memory_space<vmem>>, vector<128x128xbf16>,
    } else {
    }
    return
  }
  func.func @transform_0(%arg0: i32, %arg1: i32) -> (i32, i32) {
    %c0_i32 = arith.constant 0 : i32
    return %arg0, %arg1 : i32, i32
  }
  func.func @transform_1(%arg0: i32, %arg1: i32) -> (i32, i32) {
    %c0_i32 = arith.constant 0 : i32
    %c0_i32_0 = arith.constant 0 : i32
    return %arg1, %c0_i32 : i32, i32
  }
  func.func @transform_2(%arg0: i32, %arg1: i32) -> (i32, i32) {
    %c0_i32 = arith.constant 0 : i32
    %c0_i32_0 = arith.constant 0 : i32
    %c0_i32_1 = arith.constant 0 : i32
    return %c0_i32, %c0_i32_0 : i32, i32
  }
  func.func @transform_3(%arg0: i32, %arg1: i32) -> (i32, i32) {
    %c0_i32 = arith.constant 0 : i32
    %c0_i32_0 = arith.constant 0 : i32
    return %arg0, %c0_i32 : i32, i32
  }
}

</mosaic_0001>

<bundles_post_ra>
// kernel: tpu_custom_call.1
= control target key start
LH: loop header
LB: loop body
LE: loop exit
PB: predicated region body
PF: predicated region fallthrough
CT: control target
= control target key end

     0   :  { %vm84_vm0 = vcmask 130048   ;;  %s460_s0 = inlined_call_operand.vmem [shape: f32[128,16], index: 0, kind: input, shape index: {}]   ;;  %s461_s1 = inlined_call_operand.vmem [shape: bf16[16,128], index: 1, kind: input, shape index: {}]   ;;  %s462_s2 = inlined_call_operand.vmem [shape: f32[1,128], index: 2, kind: input, shape index: {}]   ;;  %s463_s3 = inlined_call_operand.hbm [shape: bf16[128,128], index: 3, kind: output, shape index: {}]  }
   0x1   :  { %v291_v0 = vld [vmem:[%s461_s1] sm:$0xff]  ;;  %v53_v2 = vld [vmem:[%s460_s0 + $0x8] sm:$0xff] }
   0x2   :  { %v52_v1 = vld [vmem:[%s460_s0] sm:$0xff]  ;;  %v57_v5 = vld [vmem:[%s460_s0 + $0x28] sm:$0xff]  ;;  %116 = vmatpush.bf16.msra.mxu0 %v291_v0  ;;  %339 = vmatpush.bf16.msra.mxu1 %v291_v0 }
   0x3   :  { %v68_v3 = vpack.c.bf16 %v53_v2, %v52_v1  ;;  %v56_v4 = vld [vmem:[%s460_s0 + $0x20] sm:$0xff]  ;;  %v61_v8 = vld [vmem:[%s460_s0 + $0x48] sm:$0xff]  ;;  %340 = vmatpush.bf16.msra.mxu2 %v291_v0  ;;  %341 = vmatpush.bf16.msra.mxu3 %v291_v0 }
   0x4   :  { %v60_v6 = vld [vmem:[%s460_s0 + $0x40] sm:$0xff]  ;;  %v70_v7 = vpack.c.bf16 %v57_v5, %v56_v4  ;;  %v65_v10 = vld [vmem:[%s460_s0 + $0x68] sm:$0xff] }
   0x5   :  { %v64_v9 = vld [vmem:[%s460_s0 + $0x60] sm:$0xff]  ;;  %v72_v11 = vpack.c.bf16 %v61_v8, %v60_v6  ;;  %283 = vmatmul.msk.bf16.vlgmr.msra.gmra.mxu0 %vm84_vm0, %v68_v3 }
   0x6   :  { %v74_v12 = vpack.c.bf16 %v65_v10, %v64_v9  ;;  %285 = vmatmul.msk.bf16.vlgmr.msra.gmra.mxu1 %vm84_vm0, %v70_v7 }
   0x7   :  { %287 = vmatmul.msk.bf16.vlgmr.msra.gmra.mxu2 %vm84_vm0, %v72_v11 }
   0x8   :  { %289 = vmatmul.msk.bf16.vlgmr.msra.gmra.mxu3 %vm84_vm0, %v74_v12 }
   0x9   :  { %8 = vsyncpa [#allocation4], 0  ;;  %v54_v13 = vld [vmem:[%s460_s0 + $0x10] sm:$0xff]  ;;  %v55_v14 = vld [vmem:[%s460_s0 + $0x18] sm:$0xff]  ;;  %s267_s22 = sshll.u32 %s463_s3, 4  ;;  %s373_s23 = smov 64   ;;  %s268_s22 = int_to_ptr.hbm [resolvable:$true] %s267_s22 }
   0xa   :  { %v58_v15 = vld [vmem:[%s460_s0 + $0x30] sm:$0xff]  ;;  %v59_v16 = vld [vmem:[%s460_s0 + $0x38] sm:$0xff]  ;;  %v69_v21 = vpack.c.bf16 %v55_v14, %v54_v13  ;;  %v345_v27 = vld [vmem:[%s462_s2] ss:$0 sm:$0xff]  ;;  %s374_s1 = smov 4  }
   0xb   :  { %v62_v17 = vld [vmem:[%s460_s0 + $0x50] sm:$0xff]  ;;  %v63_v18 = vld [vmem:[%s460_s0 + $0x58] sm:$0xff]  ;;  %v71_v22 = vpack.c.bf16 %v59_v16, %v58_v15 }
   0xc   :  { %v66_v19 = vld [vmem:[%s460_s0 + $0x70] sm:$0xff]  ;;  %v67_v20 = vld [vmem:[%s460_s0 + $0x78] sm:$0xff]  ;;  %v73_v23 = vpack.c.bf16 %v63_v18, %v62_v17  ;;  %s372_s0 = smov [#allocation3]  }
   0xd   :  { %v75_v24 = vpack.c.bf16 %v67_v20, %v66_v19  ;;  %s265_s2 = sshll.u32 %s372_s0, 4  ;;  %s266_s2 = int_to_ptr.vmem [resolvable:$true] %s265_s2 }
  0x15   :  { %284 = vmatmul.msk.bf16.gmra.mxu0 %vm84_vm0, %v69_v21 }
  0x16   :  { %286 = vmatmul.msk.bf16.gmra.mxu1 %vm84_vm0, %v71_v22 }
  0x17   :  { %288 = vmatmul.msk.bf16.gmra.mxu2 %vm84_vm0, %v73_v23 }
  0x18   :  { %290 = vmatmul.msk.bf16.gmra.mxu3 %vm84_vm0, %v75_v24 }
  0x82   :  { %v118_v25 = vpop.f32.mrf.mxu0 }
  0x83   :  { %v128_v26 = vpop.f32.mrf.mxu1  ;;  %v213_v32 = vadd.f32 %v345_v27, %v118_v25 }
  0x84   :  { %v217_v33 = vadd.f32 %v345_v27, %v128_v26 }
  0x8a   :  { %v138_v28 = vpop.f32.mrf.mxu2  ;;  %v120_v30 = vpop.f32.mrf.mxu0 }
  0x8b   :  { %v148_v29 = vpop.f32.mrf.mxu3  ;;  %v130_v31 = vpop.f32.mrf.mxu1  ;;  %v214_v34 = vadd.f32 %v345_v27, %v120_v30  ;;  %v221_v40 = vadd.f32 %v345_v27, %v138_v28 }
  0x8c   :  { %v218_v35 = vadd.f32 %v345_v27, %v130_v31  ;;  %v225_v41 = vadd.f32 %v345_v27, %v148_v29 }
  0x8d   :  { %v295_v36 = vpack.c.bf16 %v214_v34, %v213_v32 }
  0x8e   :  { %v305_v37 = vpack.c.bf16 %v218_v35, %v217_v33 }
  0x8f   :  { %296 = vst [vmem:[#allocation3] sm:$0xff] %v295_v36  }
  0x90   :  { %333 = vst [vmem:[#allocation3 + $0x10] sm:$0xff] %v305_v37  }
  0x92   :  { %v140_v38 = vpop.f32.mrf.mxu2  ;;  %v123_v44 = vpop.f32.mrf.mxu0 }
  0x93   :  { %v150_v39 = vpop.f32.mrf.mxu3  ;;  %v222_v42 = vadd.f32 %v345_v27, %v140_v38  ;;  %v133_v45 = vpop.f32.mrf.mxu1  ;;  %v215_v52 = vadd.f32 %v345_v27, %v123_v44 }
  0x94   :  { %v226_v43 = vadd.f32 %v345_v27, %v150_v39  ;;  %v219_v53 = vadd.f32 %v345_v27, %v133_v45 }
  0x95   :  { %v315_v46 = vpack.c.bf16 %v222_v42, %v221_v40 }
  0x96   :  { %v325_v47 = vpack.c.bf16 %v226_v43, %v225_v41 }
  0x97   :  { %335 = vst [vmem:[#allocation3 + $0x20] sm:$0xff] %v315_v46  }
  0x98   :  { %337 = vst [vmem:[#allocation3 + $0x30] sm:$0xff] %v325_v47  }
  0x9a   :  { %v143_v48 = vpop.f32.mrf.mxu2  ;;  %v125_v50 = vpop.f32.mrf.mxu0 }
  0x9b   :  { %v153_v49 = vpop.f32.mrf.mxu3  ;;  %v135_v51 = vpop.f32.mrf.mxu1  ;;  %v216_v54 = vadd.f32 %v345_v27, %v125_v50  ;;  %v223_v60 = vadd.f32 %v345_v27, %v143_v48 }
  0x9c   :  { %v220_v55 = vadd.f32 %v345_v27, %v135_v51  ;;  %v227_v61 = vadd.f32 %v345_v27, %v153_v49 }
  0x9d   :  { %v300_v56 = vpack.c.bf16 %v216_v54, %v215_v52 }
  0x9e   :  { %v310_v57 = vpack.c.bf16 %v220_v55, %v219_v53 }
  0x9f   :  { %332 = vst [vmem:[#allocation3 + $0x8] sm:$0xff] %v300_v56  }
  0xa0   :  { %334 = vst [vmem:[#allocation3 + $0x18] sm:$0xff] %v310_v57  }
  0xa2   :  { %v145_v58 = vpop.f32.mrf.mxu2 }
  0xa3   :  { %v155_v59 = vpop.f32.mrf.mxu3  ;;  %v224_v62 = vadd.f32 %v345_v27, %v145_v58 }
  0xa4   :  { %v228_v63 = vadd.f32 %v345_v27, %v155_v59 }
  0xa5   :  { %v320_v0 = vpack.c.bf16 %v224_v62, %v223_v60 }
  0xa6   :  { %v330_v1 = vpack.c.bf16 %v228_v63, %v227_v61 }
  0xa7   :  { %336 = vst [vmem:[#allocation3 + $0x28] sm:$0xff] %v320_v0  }
  0xa8   :  { %338 = vst [vmem:[#allocation3 + $0x38] sm:$0xff] %v330_v1  }
  0xa9   :  { %273 = dma.vmem_to_hbm [thread:$0]  %s266_s2, 1024, %s268_s22, [#allocation4], %s373_s23, %s373_s23, %s374_s1  }
  0xaa   :  { %370 = dma.done.wait [#allocation4], 1024  }
  0xab   :  { %371 = vsyncadd [#allocation4], 4294966272 }
  0xac   :  { %278 = vsyncpa [#allocation4], 1 }

</bundles_post_ra>
